<compile_context>
chip_gen: v5e
topology: v5e:2x2
jax: 0.10.0
libtpu: 0.0.40
codegen_flags: <defaults>
</compile_context>

<pallas_src>
import jax
import jax.numpy as jnp
from jax import lax
from jax.experimental import pallas as pl
from jax.experimental.pallas import tpu as pltpu

ALPHA = 0.1
EPS = 1e-8


def _round_up(x, m):
    return ((x + m - 1) // m) * m


def _make_damsm_kernel(B, N, tb, tn, alpha, eps):
    inv_alpha = 1.0 / alpha
    inv_b = 1.0 / B
    eps_sq = eps * eps

    def kernel(a_ref, p_ref, n_ref, out_ref, acc_ref):
        i = pl.program_id(0)           # anchor-tile index
        j = pl.program_id(1)           # negative-tile index (reduction axis)
        nj = pl.num_programs(1)

        # -------- init accumulators --------
        @pl.when(j == 0)
        def _():
            acc_ref[...] = jnp.zeros_like(acc_ref)

        @pl.when(jnp.logical_and(i == 0, j == 0))
        def _():
            out_ref[0, 0] = 0.0

        a = a_ref[...].astype(jnp.float32)           # (tb, D)
        p = p_ref[...].astype(jnp.float32)           # (tb, D)
        n = n_ref[...].astype(jnp.float32)           # (tn, D)

        # Row norms via rsqrt (EUP slot) + multiplies instead of sqrt+divide.
        # Clamping the squared norm at eps^2 == clamping the norm at eps.
        a_sq = jnp.sum(a * a, axis=1, keepdims=True)          # (tb, 1)
        p_sq = jnp.sum(p * p, axis=1, keepdims=True)          # (tb, 1)
        n_sq = jnp.sum(n * n, axis=1, keepdims=True)          # (tn, 1)
        inv_a = lax.rsqrt(jnp.maximum(a_sq, eps_sq))
        inv_n = lax.rsqrt(jnp.maximum(n_sq, eps_sq))

        # pos_sim = a.p / max(||a||*||p||, eps)  (torch CosineSimilarity)
        dot_ap = jnp.sum(a * p, axis=1, keepdims=True)        # (tb, 1)
        pos_sim = dot_ap * lax.rsqrt(jnp.maximum(a_sq * p_sq, eps_sq))

        a_unit = a * inv_a
        n_unit = n * inv_n

        # Keep the MXU operands bf16 when the inputs already are bf16.
        mxu_dtype = jnp.bfloat16 if a_ref.dtype == jnp.bfloat16 else jnp.float32
        # Contract on the last (lane) axis of BOTH operands: no n_unit.T, so
        # no XLU transpose of the negative tile before the MXU push.
        neg_mat = lax.dot_general(
            a_unit.astype(mxu_dtype), n_unit.astype(mxu_dtype),
            dimension_numbers=(((1,), (1,)), ((), ())),
            preferred_element_type=jnp.float32)               # (tb, tn)

        # exp((neg - pos) / alpha) with multiplies only (no full-tile divide).
        shift = pos_sim * inv_alpha                           # (tb, 1)
        e = jnp.exp(neg_mat * inv_alpha - shift)              # (tb, tn)

        # Mask padded negative columns of the last tile.
        col_ids = j * tn + lax.broadcasted_iota(jnp.int32, (tb, tn), 1)
        e = jnp.where(col_ids < N, e, 0.0)

        acc_ref[...] += jnp.sum(e, axis=1, keepdims=True)     # (tb, 1)

        # -------- finalize this anchor tile at the last negative tile --------
        @pl.when(j == nj - 1)
        def _():
            row_ids = i * tb + lax.broadcasted_iota(jnp.int32, (tb, 1), 0)
            contrib = jnp.where(row_ids < B,
                                jnp.log(1.0 + acc_ref[...]), 0.0)
            out_ref[0, 0] += jnp.sum(contrib) * inv_b

    return kernel


def damsm_loss(anchor, positive, negative, *, alpha=ALPHA, eps=EPS,
               tb=256, tn=256):
    """Pallas TPU implementation of DAMSMLoss.forward; returns a scalar."""
    B, D = anchor.shape
    N, Dn = negative.shape
    assert positive.shape == (B, D) and Dn == D

    # Tile sizes: MXU-friendly 256 by default, shrunk for small problems.
    tb = min(tb, _round_up(B, 8))
    tn = min(tn, _round_up(N, 8))
    Bp = _round_up(B, tb)
    Np = _round_up(N, tn)
    if Bp != B:
        pad = ((0, Bp - B), (0, 0))
        anchor = jnp.pad(anchor, pad)
        positive = jnp.pad(positive, pad)
    if Np != N:
        negative = jnp.pad(negative, ((0, Np - N), (0, 0)))

    grid = (Bp // tb, Np // tn)
    kernel = _make_damsm_kernel(B, N, tb, tn, alpha, eps)

    out = pl.pallas_call(
        kernel,
        out_shape=jax.ShapeDtypeStruct((1, 1), jnp.float32),
        grid_spec=pltpu.PrefetchScalarGridSpec(
            num_scalar_prefetch=0,
            grid=grid,
            in_specs=[
                pl.BlockSpec((tb, D), lambda i, j: (i, 0)),   # anchor
                pl.BlockSpec((tb, D), lambda i, j: (i, 0)),   # positive
                pl.BlockSpec((tn, D), lambda i, j: (j, 0)),   # negative
            ],
            # Scalar loss accumulated in SMEM (avoids a padded (8,128) VMEM
            # output tile + masked vst).
            out_specs=pl.BlockSpec((1, 1), lambda i, j: (0, 0),
                                   memory_space=pltpu.MemorySpace.SMEM),
            scratch_shapes=[pltpu.VMEM((tb, 1), jnp.float32)],
        ),
        # Both axes "arbitrary": the scalar output (and per-row accumulator)
        # is revisited across both grid axes.
        # TODO(synk): for v7x megacore, emit per-B-tile partial sums so the B
        # axis can be marked "parallel" and the final mean done in the wrapper.
        compiler_params=pltpu.CompilerParams(
            dimension_semantics=("arbitrary", "arbitrary")),
    )(anchor, positive, negative)
    return out[0, 0]


def damsm_loss_ref(anchor, positive, negative, alpha=ALPHA, eps=EPS):
    """Pure-JAX reference mirroring the PyTorch module."""
    a_n = jnp.linalg.norm(anchor, axis=1, keepdims=True)
    p_n = jnp.linalg.norm(positive, axis=1, keepdims=True)
    n_n = jnp.linalg.norm(negative, axis=1, keepdims=True)
    pos_sim = jnp.sum(anchor * positive, axis=1, keepdims=True) / jnp.maximum(
        a_n * p_n, eps)
    a_unit = anchor / jnp.maximum(a_n, eps)
    n_unit = negative / jnp.maximum(n_n, eps)
    neg_mat = a_unit @ n_unit.T
    logit = jnp.exp((neg_mat - pos_sim) / alpha)
    logit = jnp.log(1.0 + jnp.sum(logit, axis=1))
    return jnp.mean(logit)


if __name__ == "__main__":
    key = jax.random.PRNGKey(0)
    k1, k2, k3, k4, k5, k6 = jax.random.split(key, 6)

    # Case 1: tile-aligned shapes (single grid step).
    B, N, D = 8, 8, 128
    anchor = jax.random.normal(k1, (B, D), dtype=jnp.float32)
    positive = jax.random.normal(k2, (B, D), dtype=jnp.float32)
    negative = jax.random.normal(k3, (N, D), dtype=jnp.float32)
    loss = jax.block_until_ready(damsm_loss(anchor, positive, negative))
    ref = jax.block_until_ready(damsm_loss_ref(anchor, positive, negative))
    assert jnp.isfinite(loss), "non-finite loss"
    assert jnp.allclose(loss, ref, rtol=1e-5, atol=1e-5), (loss, ref)

    # Case 2: ragged shapes with small tiles -> exercises the (2, 3) grid,
    # the per-row accumulator across negative tiles, and the padding masks.
    B2, N2, D2 = 12, 20, 96
    anchor2 = jax.random.normal(k4, (B2, D2), dtype=jnp.float32)
    positive2 = jax.random.normal(k5, (B2, D2), dtype=jnp.float32)
    negative2 = jax.random.normal(k6, (N2, D2), dtype=jnp.float32)
    loss2 = jax.block_until_ready(
        damsm_loss(anchor2, positive2, negative2, tb=8, tn=8))
    ref2 = jax.block_until_ready(damsm_loss_ref(anchor2, positive2, negative2))
    assert jnp.isfinite(loss2), "non-finite loss (ragged)"
    assert jnp.allclose(loss2, ref2, rtol=1e-5, atol=1e-5), (loss2, ref2)

    print("KERNEL_OK")
</pallas_src>

<mosaic_0001>
module attributes {stable_mosaic.version = 11 : i64} {
  func.func @kernel(%arg0: i32, %arg1: i32, %arg2: memref<8x128xf32, #tpu.memory_space<vmem>>, %arg3: memref<8x128xf32, #tpu.memory_space<vmem>>, %arg4: memref<8x128xf32, #tpu.memory_space<vmem>>, %arg5: memref<1x1xf32, #tpu.memory_space<smem>>, %arg6: memref<8x1xf32, #tpu.memory_space<vmem>>) attributes {dimension_semantics = [#tpu.dimension_semantics<arbitrary>, #tpu.dimension_semantics<arbitrary>], iteration_bounds = array<i64: 1, 1>, scalar_prefetch = 0 : i64, scratch_operands = 1 : i64, tpu.core_type = #tpu.core_type<tc>, window_params = [{transform_indices = @transform_0, window_bounds = array<i64: 8, 128>}, {transform_indices = @transform_1, window_bounds = array<i64: 8, 128>}, {transform_indices = @transform_2, window_bounds = array<i64: 8, 128>}, {transform_indices = @transform_3, window_bounds = array<i64: 1, 1>}]} {
    %c0_i32 = arith.constant 0 : i32
    %0 = arith.cmpi eq, %arg1, %c0_i32 : i32
    %1 = arith.extui %0 : i1 to i32
    %c0_i32_0 = arith.constant 0 : i32
    %2 = arith.cmpi ne, %1, %c0_i32_0 : i32
    scf.if %2 {
      %cst_27 = arith.constant 0.000000e+00 : f32
      %62 = vector.broadcast %cst_27 : f32 to vector<8x1xf32>
      %c0_28 = arith.constant 0 : index
      %c0_29 = arith.constant 0 : index
      %63 = vector.load %arg6[%c0_28, %c0_29] : memref<8x1xf32, #tpu.memory_space<vmem>>, vector<8x1xf32>
      tpu.vector_store %arg6[%c0_28, %c0_29], %62 {strides = array<i32>} : memref<8x1xf32, #tpu.memory_space<vmem>>, vector<8x1xf32>,
    } else {
    }
    %c0_i32_1 = arith.constant 0 : i32
    %3 = arith.cmpi eq, %arg0, %c0_i32_1 : i32
    %c0_i32_2 = arith.constant 0 : i32
    %4 = arith.cmpi eq, %arg1, %c0_i32_2 : i32
    %5 = arith.andi %3, %4 : i1
    %6 = arith.extui %5 : i1 to i32
    %c0_i32_3 = arith.constant 0 : i32
    %7 = arith.cmpi ne, %6, %c0_i32_3 : i32
    scf.if %7 {
      %cst_27 = arith.constant 0.000000e+00 : f32
      %c0_28 = arith.constant 0 : index
      %c0_29 = arith.constant 0 : index
      %62 = memref.load %arg5[%c0_28, %c0_29] : memref<1x1xf32, #tpu.memory_space<smem>>
      memref.store %cst_27, %arg5[%c0_28, %c0_29] : memref<1x1xf32, #tpu.memory_space<smem>>
    } else {
    }
    %c0 = arith.constant 0 : index
    %c0_4 = arith.constant 0 : index
    %8 = vector.load %arg2[%c0, %c0_4] : memref<8x128xf32, #tpu.memory_space<vmem>>, vector<8x128xf32>
    %c0_5 = arith.constant 0 : index
    %c0_6 = arith.constant 0 : index
    %9 = vector.load %arg3[%c0_5, %c0_6] : memref<8x128xf32, #tpu.memory_space<vmem>>, vector<8x128xf32>
    %c0_7 = arith.constant 0 : index
    %c0_8 = arith.constant 0 : index
    %10 = vector.load %arg4[%c0_7, %c0_8] : memref<8x128xf32, #tpu.memory_space<vmem>>, vector<8x128xf32>
    %11 = arith.mulf %8, %8 : vector<8x128xf32>
    %cst = arith.constant dense<0.000000e+00> : vector<8xf32>
    %12 = vector.multi_reduction <add>, %11, %cst [1] : vector<8x128xf32> to vector<8xf32>
    %13 = vector.shape_cast %12 : vector<8xf32> to vector<8x1xf32>
    %14 = arith.mulf %9, %9 : vector<8x128xf32>
    %cst_9 = arith.constant dense<0.000000e+00> : vector<8xf32>
    %15 = vector.multi_reduction <add>, %14, %cst_9 [1] : vector<8x128xf32> to vector<8xf32>
    %16 = vector.shape_cast %15 : vector<8xf32> to vector<8x1xf32>
    %17 = arith.mulf %10, %10 : vector<8x128xf32>
    %cst_10 = arith.constant dense<0.000000e+00> : vector<8xf32>
    %18 = vector.multi_reduction <add>, %17, %cst_10 [1] : vector<8x128xf32> to vector<8xf32>
    %19 = vector.shape_cast %18 : vector<8xf32> to vector<8x1xf32>
    %cst_11 = arith.constant 1.000000e-16 : f32
    %20 = vector.broadcast %cst_11 : f32 to vector<8x1xf32>
    %21 = arith.maximumf %13, %20 : vector<8x1xf32>
    %22 = math.rsqrt %21 : vector<8x1xf32>
    %cst_12 = arith.constant 1.000000e-16 : f32
    %23 = vector.broadcast %cst_12 : f32 to vector<8x1xf32>
    %24 = arith.maximumf %19, %23 : vector<8x1xf32>
    %25 = math.rsqrt %24 : vector<8x1xf32>
    %26 = arith.mulf %8, %9 : vector<8x128xf32>
    %cst_13 = arith.constant dense<0.000000e+00> : vector<8xf32>
    %27 = vector.multi_reduction <add>, %26, %cst_13 [1] : vector<8x128xf32> to vector<8xf32>
    %28 = vector.shape_cast %27 : vector<8xf32> to vector<8x1xf32>
    %29 = arith.mulf %13, %16 : vector<8x1xf32>
    %cst_14 = arith.constant 1.000000e-16 : f32
    %30 = vector.broadcast %cst_14 : f32 to vector<8x1xf32>
    %31 = arith.maximumf %29, %30 : vector<8x1xf32>
    %32 = math.rsqrt %31 : vector<8x1xf32>
    %33 = arith.mulf %28, %32 : vector<8x1xf32>
    %34 = vector.broadcast %22 : vector<8x1xf32> to vector<8x128xf32>
    %35 = arith.mulf %8, %34 : vector<8x128xf32>
    %36 = vector.broadcast %25 : vector<8x1xf32> to vector<8x128xf32>
    %37 = arith.mulf %10, %36 : vector<8x128xf32>
    %cst_15 = arith.constant dense<0.000000e+00> : vector<8x8xf32>
    %38 = tpu.matmul %35, %37, %cst_15 {dimension_numbers = #tpu.dot_dimension_numbers<[1], [1], [0], [0], [0, 0, 1, 0], [], []>} : vector<8x128xf32>, vector<8x128xf32>, vector<8x8xf32> -> vector<8x8xf32>
    %cst_16 = arith.constant 1.000000e+01 : f32
    %39 = vector.broadcast %cst_16 : f32 to vector<8x1xf32>
    %40 = arith.mulf %33, %39 : vector<8x1xf32>
    %cst_17 = arith.constant 1.000000e+01 : f32
    %41 = vector.broadcast %cst_17 : f32 to vector<8x8xf32>
    %42 = arith.mulf %38, %41 : vector<8x8xf32>
    %43 = vector.broadcast %40 : vector<8x1xf32> to vector<8x8xf32>
    %44 = arith.subf %42, %43 : vector<8x8xf32>
    %45 = math.exp %44 : vector<8x8xf32>
    %c8_i32 = arith.constant 8 : i32
    %46 = arith.muli %arg1, %c8_i32 : i32
    %47 = tpu.iota {dimensions = array<i32: 1>} : vector<8x8xi32>
    %48 = vector.broadcast %46 : i32 to vector<8x8xi32>
    %49 = arith.addi %48, %47 : vector<8x8xi32>
    %c8_i32_18 = arith.constant 8 : i32
    %50 = vector.broadcast %c8_i32_18 : i32 to vector<8x8xi32>
    %51 = arith.cmpi slt, %49, %50 : vector<8x8xi32>
    %cst_19 = arith.constant 0.000000e+00 : f32
    %52 = vector.broadcast %cst_19 : f32 to vector<8x8xf32>
    %53 = arith.select %51, %45, %52 : vector<8x8xi1>, vector<8x8xf32>
    %c0_20 = arith.constant 0 : index
    %c0_21 = arith.constant 0 : index
    %54 = vector.load %arg6[%c0_20, %c0_21] : memref<8x1xf32, #tpu.memory_space<vmem>>, vector<8x1xf32>
    %cst_22 = arith.constant dense<0.000000e+00> : vector<8xf32>
    %55 = vector.multi_reduction <add>, %53, %cst_22 [1] : vector<8x8xf32> to vector<8xf32>
    %56 = vector.shape_cast %55 : vector<8xf32> to vector<8x1xf32>
    %57 = arith.addf %54, %56 : vector<8x1xf32>
    %c0_23 = arith.constant 0 : index
    %c0_24 = arith.constant 0 : index
    %58 = vector.load %arg6[%c0_23, %c0_24] : memref<8x1xf32, #tpu.memory_space<vmem>>, vector<8x1xf32>
    tpu.vector_store %arg6[%c0_23, %c0_24], %57 {strides = array<i32>} : memref<8x1xf32, #tpu.memory_space<vmem>>, vector<8x1xf32>,
    %c0_i32_25 = arith.constant 0 : i32
    %59 = arith.cmpi eq, %arg1, %c0_i32_25 : i32
    %60 = arith.extui %59 : i1 to i32
    %c0_i32_26 = arith.constant 0 : i32
    %61 = arith.cmpi ne, %60, %c0_i32_26 : i32
    scf.if %61 {
      %c8_i32_27 = arith.constant 8 : i32
      %62 = arith.muli %arg0, %c8_i32_27 : i32
      %63 = tpu.iota {dimensions = array<i32: 0>} : vector<8x1xi32>
      %64 = vector.broadcast %62 : i32 to vector<8x1xi32>
      %65 = arith.addi %64, %63 : vector<8x1xi32>
      %c8_i32_28 = arith.constant 8 : i32
      %66 = vector.broadcast %c8_i32_28 : i32 to vector<8x1xi32>
      %67 = arith.cmpi slt, %65, %66 : vector<8x1xi32>
      %c0_29 = arith.constant 0 : index
      %c0_30 = arith.constant 0 : index
      %68 = vector.load %arg6[%c0_29, %c0_30] : memref<8x1xf32, #tpu.memory_space<vmem>>, vector<8x1xf32>
      %cst_31 = arith.constant 1.000000e+00 : f32
      %69 = vector.broadcast %cst_31 : f32 to vector<8x1xf32>
      %70 = arith.addf %69, %68 : vector<8x1xf32>
      %71 = math.log %70 : vector<8x1xf32>
      %cst_32 = arith.constant 0.000000e+00 : f32
      %72 = vector.broadcast %cst_32 : f32 to vector<8x1xf32>
      %73 = arith.select %67, %71, %72 : vector<8x1xi1>, vector<8x1xf32>
      %c0_33 = arith.constant 0 : index
      %c0_34 = arith.constant 0 : index
      %74 = memref.load %arg5[%c0_33, %c0_34] : memref<1x1xf32, #tpu.memory_space<smem>>
      %75 = vector.shape_cast %73 : vector<8x1xf32> to vector<1x8x1xf32>
      %cst_35 = arith.constant dense<0.000000e+00> : vector<1xf32>
      %76 = vector.multi_reduction <add>, %75, %cst_35 [1, 2] : vector<1x8x1xf32> to vector<1xf32>
      %77 = vector.shape_cast %76 : vector<1xf32> to vector<1x1x1xf32>
      %78 = vector.extract %77[0, 0, 0] : f32 from vector<1x1x1xf32>
      %cst_36 = arith.constant 1.250000e-01 : f32
      %79 = arith.mulf %78, %cst_36 : f32
      %80 = arith.addf %74, %79 : f32
      %c0_37 = arith.constant 0 : index
      %c0_38 = arith.constant 0 : index
      %81 = memref.load %arg5[%c0_37, %c0_38] : memref<1x1xf32, #tpu.memory_space<smem>>
      memref.store %80, %arg5[%c0_37, %c0_38] : memref<1x1xf32, #tpu.memory_space<smem>>
    } else {
    }
    return
  }
  func.func @transform_0(%arg0: i32, %arg1: i32) -> (i32, i32) {
    %c0_i32 = arith.constant 0 : i32
    %c0_i32_0 = arith.constant 0 : i32
    return %arg0, %c0_i32 : i32, i32
  }
  func.func @transform_1(%arg0: i32, %arg1: i32) -> (i32, i32) {
    %c0_i32 = arith.constant 0 : i32
    %c0_i32_0 = arith.constant 0 : i32
    return %arg0, %c0_i32 : i32, i32
  }
  func.func @transform_2(%arg0: i32, %arg1: i32) -> (i32, i32) {
    %c0_i32 = arith.constant 0 : i32
    %c0_i32_0 = arith.constant 0 : i32
    return %arg1, %c0_i32 : i32, i32
  }
  func.func @transform_3(%arg0: i32, %arg1: i32) -> (i32, i32) {
    %c0_i32 = arith.constant 0 : i32
    %c0_i32_0 = arith.constant 0 : i32
    %c0_i32_1 = arith.constant 0 : i32
    return %c0_i32, %c0_i32_0 : i32, i32
  }
}

</mosaic_0001>

<bundles_post_ra>
// kernel: tpu_custom_call.1
= control target key start
LH: loop header
LB: loop body
LE: loop exit
PB: predicated region body
PF: predicated region fallthrough
CT: control target
= control target key end

     0   :  { %8 = vsyncpa [#allocation4], 0  ;;  %s355_s0 = inlined_call_operand.hbm [shape: f32[8,128], index: 0, kind: input, shape index: {}]   ;;  %s356_s1 = inlined_call_operand.hbm [shape: f32[8,128], index: 1, kind: input, shape index: {}]   ;;  %s357_s2 = inlined_call_operand.hbm [shape: f32[8,128], index: 2, kind: input, shape index: {}]   ;;  %s358_s3 = inlined_call_operand.hbm [shape: f32[1,1], index: 3, kind: output, shape index: {}]  }
   0x1   :  { %9 = vsyncpa [#allocation7], 0  ;;  %s27_s14 = sshll.u32 %s356_s1, 4  ;;  %s28_s14 = int_to_ptr.hbm [resolvable:$true] %s27_s14 }
   0x2   :  { %10 = vsyncpa [#allocation5], 0  ;;  %s315_s15 = smov [#allocation6]   ;;  %s16_s19 = sshll.u32 %s355_s0, 4  ;;  %s17_s19 = int_to_ptr.hbm [resolvable:$true] %s16_s19 }
   0x3   :  { %s29_s16 = sshll.u32 %s315_s15, 4  ;;  %s316_s20 = smov [#allocation3]   ;;  %s30_s16 = int_to_ptr.vmem [resolvable:$true] %s29_s16 }
   0x4   :  { %32 = dma.hbm_to_vmem [thread:$0]  %s28_s14, 128, %s30_s16, [#allocation7]  }
   0x5   :  { %s18_s21 = sshll.u32 %s316_s20, 4  ;;  %s38_s24 = sshll.u32 %s357_s2, 4  ;;  %s19_s21 = int_to_ptr.vmem [resolvable:$true] %s18_s21  ;;  %s39_s24 = int_to_ptr.hbm [resolvable:$true] %s38_s24 }
   0x6   :  { %21 = dma.hbm_to_vmem [thread:$0]  %s17_s19, 128, %s19_s21, [#allocation4]  }
   0x7   :  { %s317_s1 = smov [#allocation8]  }
   0x8   :  { %s40_s25 = sshll.u32 %s317_s1, 4  ;;  %s41_s25 = int_to_ptr.vmem [resolvable:$true] %s40_s25 }
   0x9   :  { %43 = dma.hbm_to_vmem [thread:$0]  %s39_s24, 128, %s41_s25, [#allocation7]  }
   0xa   :  { %309 = dma.done.wait [#allocation4], 128  }
   0xb   :  { %310 = vsyncadd [#allocation4], 4294967168 }
   0xc   :  { %311 = dma.done.wait [#allocation7], 256  }
   0xd   :  { %312 = vsyncadd [#allocation7], 4294967040  ;;  %v71_v0 = vld [vmem:[#allocation8] sm:$0xff]  ;;  %v70_v1 = vld [vmem:[#allocation6] sm:$0xff]  ;;  %vm60_vm6 = vcmask 7168   ;;  %v318_v34 = vmov 0.0   ;;  %v147_v44 = vlaneseq }
   0xe   :  { %v78_v2 = vmul.f32 %v71_v0, %v71_v0  ;;  %v75_v3 = vmul.f32 %v70_v1, %v70_v1  ;;  %v69_v4 = vld [vmem:[#allocation3] sm:$0xff]  ;;  %61 = vst.msk [vmem:[#allocation2] sm:$0xff] %vm60_vm6, %v318_v34  ;;  %vm154_vm11 = vcmask 64512   ;;  %s195_s26 = sshll.u32 %s358_s3, 4  ;;  %s319_s29 = smov [#allocation9]   ;;  %s196_s26 = int_to_ptr.hbm [resolvable:$true] %s195_s26 }
   0xf   :  { %v72_v5 = vmul.f32 %v69_v4, %v69_v4  ;;  %v103_v6 = vmul.f32 %v70_v1, %v69_v4  ;;  %v148_v46 = vand.u32 127, %v147_v44 }
  0x10   :  { %79 = vadd.xlane.f32.xlu0 %v78_v2  ;;  %76 = vadd.xlane.f32.xlu1 %v75_v3 }
  0x11   :  { %vm151_vm10 = vcmp.lt.s32.totalorder %v148_v46, 8 }
  0x15   :  { %v153_v50 = vld [vmem:[#allocation2] sm:$0xff] }
  0x18   :  { %73 = vadd.xlane.f32.xlu0 %v72_v5  ;;  %104 = vadd.xlane.f32.xlu1 %v103_v6 }
  0x83   :  { %v80_v7 = vpop.xlane.xlu0 %79  ;;  %v77_v27 = vpop.xlane.xlu1 %76 }
  0x84   :  { %v92_v8 = vmax.f32 %v80_v7, 1e-16 }
  0x86   :  { %215 = vrsqrt.f32 %v92_v8  ;;  %vm99_vm1 = vweird.f32 %v92_v8 }
  0x8b   :  { %v74_v9 = vpop.xlane.xlu0 %73  ;;  %v105_v37 = vpop.xlane.xlu1 %104 }
  0x8c   :  { %v216_v10 = vpop.eup %215  ;;  %v81_v11 = vmax.f32 %v74_v9, 1e-16  ;;  %v106_v28 = vmul.f32 %v77_v27, %v74_v9 }
  0x8d   :  { %v94_v12 = vmul.f32 %v216_v10, %v92_v8  ;;  %vm100_vm0 = vweird.f32 %v216_v10 }
  0x8e   :  { %217 = vrsqrt.f32 %v81_v11  ;;  %vm101_vm2 = vmor %vm99_vm1, %vm100_vm0  ;;  %vm88_vm4 = vweird.f32 %v81_v11  ;;  %v107_v29 = vmax.f32 %v106_v28, 1e-16 }
  0x8f   :  { %v95_v13 = vmul.f32 %v216_v10, %v94_v12 }
  0x90   :  { %219 = vrsqrt.f32 %v107_v29  ;;  %vm114_vm8 = vweird.f32 %v107_v29 }
  0x91   :  { %v96_v14 = vmul.f32 0.5, %v95_v13 }
  0x93   :  { %v97_v15 = vsub.f32 1.5, %v96_v14 }
  0x94   :  { %v218_v16 = vpop.eup %217 }
  0x95   :  { %v83_v17 = vmul.f32 %v218_v16, %v81_v11  ;;  %v98_v18 = vmul.f32 %v216_v10, %v97_v15  ;;  %vm89_vm3 = vweird.f32 %v218_v16 }
  0x96   :  { %vm90_vm5 = vmor %vm88_vm4, %vm89_vm3  ;;  %v220_v30 = vpop.eup %219 }
  0x97   :  { %v84_v19 = vmul.f32 %v218_v16, %v83_v17  ;;  %v102_v20 = vsel %vm101_vm2, %v216_v10, %v98_v18  ;;  %v109_v31 = vmul.f32 %v220_v30, %v107_v29  ;;  %vm115_vm7 = vweird.f32 %v220_v30 }
  0x98   :  { %v120_v21 = vmul.f32 %v102_v20, %v71_v0  ;;  %vm116_vm9 = vmor %vm114_vm8, %vm115_vm7 }
  0x99   :  { %v85_v22 = vmul.f32 0.5, %v84_v19  ;;  %v110_v32 = vmul.f32 %v220_v30, %v109_v31 }
  0x9a   :  { %136 = vmatpush.xpose.msra.mxu0 %v120_v21 }
  0x9b   :  { %v86_v23 = vsub.f32 1.5, %v85_v22  ;;  %v111_v33 = vmul.f32 0.5, %v110_v32 }
  0x9d   :  { %v87_v24 = vmul.f32 %v218_v16, %v86_v23  ;;  %v112_v35 = vsub.f32 1.5, %v111_v33 }
  0x9f   :  { %v91_v25 = vsel %vm90_vm5, %v218_v16, %v87_v24  ;;  %v113_v36 = vmul.f32 %v220_v30, %v112_v35 }
  0xa0   :  { %v119_v26 = vmul.f32 %v91_v25, %v69_v4 }
  0xa1   :  { %v117_v38 = vsel %vm116_vm9, %v220_v30, %v113_v36 }
  0xa2   :  { %137 = vmatmul.f32.vlgmr.msra.gmra.mxu0 %v119_v26  ;;  %v118_v39 = vmul.f32 %v117_v38, %v105_v37 }
  0xa4   :  { %v141_v41 = vmul.f32 10.0, %v118_v39 }
 0x11f   :  { %v138_v40 = vpop.f32.mrf.mxu0 }
 0x120   :  { %v142_v42 = vmul.f32 10.0, %v138_v40 }
 0x122   :  { %v143_v43 = vsub.f32 %v142_v42, %v141_v41 }
 0x124   :  { %v144_v45 = vmul.f32 1.442695, %v143_v43 }
 0x126   :  { %221 = vpow2.f32 %v144_v45 }
 0x12c   :  { %v222_v47 = vpop.eup %221 }
 0x12d   :  { %v152_v48 = vsel %vm151_vm10, %v222_v47, 0.0 }
 0x12e   :  { %v155_v49 = vsel %vm154_vm11, %v152_v48, 0.0 }
 0x12f   :  { %156 = vadd.xlane.f32.xlu2 %v155_v49 }
 0x1a2   :  { %v157_v51 = vpop.xlane.xlu2 %156 }
 0x1a3   :  { %v158_v52 = vadd.f32 %v157_v51, %v153_v50 }
 0x1a5   :  { %160 = vst.msk [vmem:[#allocation2] sm:$0xff] %vm60_vm6, %v158_v52 }
 0x1ac   :  { %v170_v53 = vld [vmem:[#allocation2] sm:$0xff] }
 0x1ad   :  { %v171_v54 = vadd.f32 1.0, %v170_v53 }
 0x1af   :  { %223 = vlog2.f32 %v171_v54 }
 0x1b5   :  { %v224_v55 = vpop.eup %223 }
 0x1b6   :  { %v173_v56 = vmul.f32 0.6931472, %v224_v55 }
 0x1b8   :  { %v176_v57 = vsel %vm60_vm6, %v173_v56, 0.0 }
 0x1b9   :  { %177 = vadd.xlane.f32.xlu2 %v176_v57 }
 0x22c   :  { %v178_v58 = vpop.xlane.xlu2 %177 }
 0x22d   :  { %v179_v59 = vrot.slane %v178_v58, 4 }
 0x22f   :  { %v180_v60 = vadd.f32 %v179_v59, %v178_v58 }
 0x231   :  { %v181_v61 = vrot.slane %v180_v60, 2 }
 0x233   :  { %v182_v62 = vadd.f32 %v181_v61, %v180_v60 }
 0x235   :  { %v183_v63 = vrot.slane %v182_v62, 1 }
 0x237   :  { %v184_v0 = vadd.f32 %v183_v63, %v182_v62 }
 0x239   :  { %207 = vpush %v184_v0 }
 0x26a   :  { %s208_s27 = spop %207 }
 0x26b   :  { %s186_s28 = smul.f32 0.125, %s208_s27 }
 0x26d   :  { %189 = sst [smem:[#allocation9]] %s186_s28 }
 0x26e   :  { %198 = dma.smem_to_hbm %s319_s29, 16, %s196_s26, [#allocation5]  }
 0x26f   :  { %313 = dma.done.wait [#allocation5], 16  }
 0x270   :  { %314 = vsyncadd [#allocation5], 4294967280 }
 0x271   :  { %203 = sfence }
 0x272   :  { %204 = vsyncpa [#allocation4], 1 }
 0x273   :  { %205 = vsyncpa [#allocation7], 1 }
 0x274   :  { %206 = vsyncpa [#allocation5], 1 }

</bundles_post_ra>
